<compile_context>
chip_gen: v7x
topology: tpu7x:2x2x1
jax: 0.10.0
libtpu: 0.0.40
codegen_flags: <defaults>
</compile_context>

<pallas_src>
import jax
import jax.numpy as jnp
from jax import lax
from jax.experimental import pallas as pl
from jax.experimental.pallas import tpu as pltpu

# Env-derived sizes (synthetic, small): env.n_observations / env.node_num
NUM_STATE = 32
NUM_ACTION = 8
H1 = 64
H2 = 16

NEG_SLOPE = 0.01  # F.leaky_relu default


def _leaky_relu(x):
    return jnp.where(x > 0, x, NEG_SLOPE * x)


def _round_up(n, m):
    return ((n + m - 1) // m) * m


def critic_kernel(x_ref, w1_ref, b1_ref, w2_ref, b2_ref, w3_ref, b3_ref, o_ref):
    """Computes the whole MLP transposed: activations are (features, TB)."""
    x = x_ref[...]                                     # (TB, NUM_STATE) f32
    # Layer 1 (NT matmul on the MXU): h1[o, b] = sum_k w1[o, k] * x[b, k]
    h = lax.dot_general(
        w1_ref[...], x, (((1,), (1,)), ((), ())),
        preferred_element_type=jnp.float32) + b1_ref[...]        # (H1, TB)
    h = _leaky_relu(h)
    # Layer 2: (H2, H1) @ (H1, TB) -> (H2, TB)
    h = jnp.dot(w2_ref[...], h, preferred_element_type=jnp.float32) + b2_ref[...]
    h = _leaky_relu(h)
    # Output head: (NUM_ACTION, H2) @ (H2, TB) -> (NUM_ACTION, TB)
    v = jnp.dot(w3_ref[...], h, preferred_element_type=jnp.float32) + b3_ref[...]
    o_ref[...] = v                                     # lane-dense, unmasked store


def _resident(shape):
    # Weights / biases: same block every grid step -> stay VMEM-resident.
    return pl.BlockSpec(shape, lambda i: (0, 0))


def critic_forward(x, params, *, tb_max=2048):
    """x: (B, NUM_STATE) f32 -> (B, NUM_ACTION) f32."""
    w1, b1, w2, b2, w3, b3 = params
    B = x.shape[0]

    # Batch tile: multiple of 128 (lane-dense output block), capped so that the
    # grid has >=2 steps when B >= 256 (v7x megacore sharding).
    tb_cap = max(128, _round_up(tb_max, 128))
    TB = min(tb_cap, _round_up(pl.cdiv(max(B, 1), 2), 128))

    # Pad only to a multiple of 128 (usually a no-op for training batches);
    # a ragged last block (B % TB != 0) is handled by Pallas's masked writeback.
    if B % 128 == 0 and B > 0:
        Bp, x_in = B, x
    else:
        Bp = _round_up(max(B, 1), 128)
        x_in = jnp.pad(x, ((0, Bp - B), (0, 0)))

    grid = (pl.cdiv(Bp, TB),)

    out_t = pl.pallas_call(
        critic_kernel,
        out_shape=jax.ShapeDtypeStruct((NUM_ACTION, Bp), jnp.float32),
        grid=grid,
        in_specs=[
            pl.BlockSpec((TB, NUM_STATE), lambda i: (i, 0)),   # x tile (batch rows)
            _resident(w1.shape), _resident(b1.shape),
            _resident(w2.shape), _resident(b2.shape),
            _resident(w3.shape), _resident(b3.shape),
        ],
        out_specs=pl.BlockSpec((NUM_ACTION, TB), lambda i: (0, i)),
        compiler_params=pltpu.CompilerParams(
            dimension_semantics=("parallel",),          # megacore sharding on v7x
            vmem_limit_bytes=32 * 1024 * 1024),
    )(x_in, w1, b1, w2, b2, w3, b3)

    # Layout plumbing only: (NUM_ACTION, Bp) -> (B, NUM_ACTION).
    return out_t[:, :B].T


def init_params(key):
    """Deterministic init mimicking nn.Linear: U(-1/sqrt(fan_in), 1/sqrt(fan_in)).
    Weights stored PyTorch-style (out, in); biases as (out, 1)."""
    ks = jax.random.split(key, 6)

    def linear(kw, kb, fan_in, fan_out):
        bound = float(fan_in) ** -0.5
        w = jax.random.uniform(kw, (fan_out, fan_in), jnp.float32, -bound, bound)
        b = jax.random.uniform(kb, (fan_out, 1), jnp.float32, -bound, bound)
        return w, b

    w1, b1 = linear(ks[0], ks[1], NUM_STATE, H1)
    w2, b2 = linear(ks[2], ks[3], H1, H2)
    w3, b3 = linear(ks[4], ks[5], H2, NUM_ACTION)
    return (w1, b1, w2, b2, w3, b3)


def critic_reference(x, params):
    w1, b1, w2, b2, w3, b3 = params
    h = _leaky_relu(x @ w1.T + b1[:, 0])
    h = _leaky_relu(h @ w2.T + b2[:, 0])
    return h @ w3.T + b3[:, 0]


if __name__ == "__main__":
    key = jax.random.PRNGKey(0)
    k_params, k1, k2, k3, k4 = jax.random.split(key, 5)
    params = init_params(k_params)

    def check(xb, tb_max=2048):
        out = jax.block_until_ready(critic_forward(xb, params, tb_max=tb_max))
        ref = critic_reference(xb, params)
        assert out.shape == (xb.shape[0], NUM_ACTION)
        assert jnp.allclose(out, ref, atol=1e-2, rtol=1e-2), \
            f"mismatch vs JAX reference (B={xb.shape[0]})"

    # Small primary test: batch=2 (padded to one 128-row tile).
    check(jax.random.normal(k1, (2, NUM_STATE), jnp.float32))

    # Ragged small batch: pads 37 -> 128, single tile.
    check(jax.random.normal(k2, (37, NUM_STATE), jnp.float32))

    # Multi-step grid with a ragged LAST block and no wrapper pad (B=384, TB=256).
    check(jax.random.normal(k3, (384, NUM_STATE), jnp.float32), tb_max=256)

    # Default large-tile path: B=4096 -> TB=2048, two grid steps, no pad.
    check(jax.random.normal(k4, (4096, NUM_STATE), jnp.float32))

    print("KERNEL_OK")
</pallas_src>

<mosaic_0001>
module attributes {stable_mosaic.version = 11 : i64} {
  func.func @critic_kernel(%arg0: i32, %arg1: memref<128x32xf32, #tpu.memory_space<vmem>>, %arg2: memref<64x32xf32, #tpu.memory_space<vmem>>, %arg3: memref<64x1xf32, #tpu.memory_space<vmem>>, %arg4: memref<16x64xf32, #tpu.memory_space<vmem>>, %arg5: memref<16x1xf32, #tpu.memory_space<vmem>>, %arg6: memref<8x16xf32, #tpu.memory_space<vmem>>, %arg7: memref<8x1xf32, #tpu.memory_space<vmem>>, %arg8: memref<8x128xf32, #tpu.memory_space<vmem>>) attributes {dimension_semantics = [#tpu.dimension_semantics<parallel>], iteration_bounds = array<i64: 1>, scalar_prefetch = 0 : i64, scratch_operands = 0 : i64, tpu.core_type = #tpu.core_type<tc>, window_params = [{transform_indices = @transform_0, window_bounds = array<i64: 128, 32>}, {pipeline_mode = #tpu.pipeline_mode<synchronous>, transform_indices = @transform_1, window_bounds = array<i64: 64, 32>}, {pipeline_mode = #tpu.pipeline_mode<synchronous>, transform_indices = @transform_2, window_bounds = array<i64: 64, 1>}, {pipeline_mode = #tpu.pipeline_mode<synchronous>, transform_indices = @transform_3, window_bounds = array<i64: 16, 64>}, {pipeline_mode = #tpu.pipeline_mode<synchronous>, transform_indices = @transform_4, window_bounds = array<i64: 16, 1>}, {pipeline_mode = #tpu.pipeline_mode<synchronous>, transform_indices = @transform_5, window_bounds = array<i64: 8, 16>}, {pipeline_mode = #tpu.pipeline_mode<synchronous>, transform_indices = @transform_6, window_bounds = array<i64: 8, 1>}, {transform_indices = @transform_7, window_bounds = array<i64: 8, 128>}]} {
    %c0 = arith.constant 0 : index
    %c0_0 = arith.constant 0 : index
    %0 = vector.load %arg1[%c0, %c0_0] : memref<128x32xf32, #tpu.memory_space<vmem>>, vector<128x32xf32>
    %c0_1 = arith.constant 0 : index
    %c0_2 = arith.constant 0 : index
    %1 = vector.load %arg2[%c0_1, %c0_2] : memref<64x32xf32, #tpu.memory_space<vmem>>, vector<64x32xf32>
    %cst = arith.constant dense<0.000000e+00> : vector<64x128xf32>
    %2 = tpu.matmul %1, %0, %cst {dimension_numbers = #tpu.dot_dimension_numbers<[1], [1], [0], [0], [0, 0, 1, 0], [], []>} : vector<64x32xf32>, vector<128x32xf32>, vector<64x128xf32> -> vector<64x128xf32>
    %c0_3 = arith.constant 0 : index
    %c0_4 = arith.constant 0 : index
    %3 = vector.load %arg3[%c0_3, %c0_4] : memref<64x1xf32, #tpu.memory_space<vmem>>, vector<64x1xf32>
    %4 = vector.broadcast %3 : vector<64x1xf32> to vector<64x128xf32>
    %5 = arith.addf %2, %4 : vector<64x128xf32>
    %cst_5 = arith.constant 0.000000e+00 : f32
    %6 = vector.broadcast %cst_5 : f32 to vector<64x128xf32>
    %7 = arith.cmpf ogt, %5, %6 : vector<64x128xf32>
    %cst_6 = arith.constant 0.00999999977 : f32
    %8 = vector.broadcast %cst_6 : f32 to vector<64x128xf32>
    %9 = arith.mulf %8, %5 : vector<64x128xf32>
    %10 = arith.select %7, %5, %9 : vector<64x128xi1>, vector<64x128xf32>
    %c0_7 = arith.constant 0 : index
    %c0_8 = arith.constant 0 : index
    %11 = vector.load %arg4[%c0_7, %c0_8] : memref<16x64xf32, #tpu.memory_space<vmem>>, vector<16x64xf32>
    %cst_9 = arith.constant dense<0.000000e+00> : vector<16x128xf32>
    %12 = tpu.matmul %11, %10, %cst_9 {dimension_numbers = #tpu.dot_dimension_numbers<[1], [0], [0], [1], [0, 0, 1, 1], [], []>} : vector<16x64xf32>, vector<64x128xf32>, vector<16x128xf32> -> vector<16x128xf32>
    %c0_10 = arith.constant 0 : index
    %c0_11 = arith.constant 0 : index
    %13 = vector.load %arg5[%c0_10, %c0_11] : memref<16x1xf32, #tpu.memory_space<vmem>>, vector<16x1xf32>
    %14 = vector.broadcast %13 : vector<16x1xf32> to vector<16x128xf32>
    %15 = arith.addf %12, %14 : vector<16x128xf32>
    %cst_12 = arith.constant 0.000000e+00 : f32
    %16 = vector.broadcast %cst_12 : f32 to vector<16x128xf32>
    %17 = arith.cmpf ogt, %15, %16 : vector<16x128xf32>
    %cst_13 = arith.constant 0.00999999977 : f32
    %18 = vector.broadcast %cst_13 : f32 to vector<16x128xf32>
    %19 = arith.mulf %18, %15 : vector<16x128xf32>
    %20 = arith.select %17, %15, %19 : vector<16x128xi1>, vector<16x128xf32>
    %c0_14 = arith.constant 0 : index
    %c0_15 = arith.constant 0 : index
    %21 = vector.load %arg6[%c0_14, %c0_15] : memref<8x16xf32, #tpu.memory_space<vmem>>, vector<8x16xf32>
    %cst_16 = arith.constant dense<0.000000e+00> : vector<8x128xf32>
    %22 = tpu.matmul %21, %20, %cst_16 {dimension_numbers = #tpu.dot_dimension_numbers<[1], [0], [0], [1], [0, 0, 1, 1], [], []>} : vector<8x16xf32>, vector<16x128xf32>, vector<8x128xf32> -> vector<8x128xf32>
    %c0_17 = arith.constant 0 : index
    %c0_18 = arith.constant 0 : index
    %23 = vector.load %arg7[%c0_17, %c0_18] : memref<8x1xf32, #tpu.memory_space<vmem>>, vector<8x1xf32>
    %24 = vector.broadcast %23 : vector<8x1xf32> to vector<8x128xf32>
    %25 = arith.addf %22, %24 : vector<8x128xf32>
    %c0_19 = arith.constant 0 : index
    %c0_20 = arith.constant 0 : index
    %26 = vector.load %arg8[%c0_19, %c0_20] : memref<8x128xf32, #tpu.memory_space<vmem>>, vector<8x128xf32>
    tpu.vector_store %arg8[%c0_19, %c0_20], %25 {strides = array<i32>} : memref<8x128xf32, #tpu.memory_space<vmem>>, vector<8x128xf32>,
    return
  }
  func.func @transform_0(%arg0: i32) -> (i32, i32) {
    %c0_i32 = arith.constant 0 : i32
    %c0_i32_0 = arith.constant 0 : i32
    return %arg0, %c0_i32 : i32, i32
  }
  func.func @transform_1(%arg0: i32) -> (i32, i32) {
    %c0_i32 = arith.constant 0 : i32
    %c0_i32_0 = arith.constant 0 : i32
    %c0_i32_1 = arith.constant 0 : i32
    return %c0_i32, %c0_i32_0 : i32, i32
  }
  func.func @transform_2(%arg0: i32) -> (i32, i32) {
    %c0_i32 = arith.constant 0 : i32
    %c0_i32_0 = arith.constant 0 : i32
    %c0_i32_1 = arith.constant 0 : i32
    return %c0_i32, %c0_i32_0 : i32, i32
  }
  func.func @transform_3(%arg0: i32) -> (i32, i32) {
    %c0_i32 = arith.constant 0 : i32
    %c0_i32_0 = arith.constant 0 : i32
    %c0_i32_1 = arith.constant 0 : i32
    return %c0_i32, %c0_i32_0 : i32, i32
  }
  func.func @transform_4(%arg0: i32) -> (i32, i32) {
    %c0_i32 = arith.constant 0 : i32
    %c0_i32_0 = arith.constant 0 : i32
    %c0_i32_1 = arith.constant 0 : i32
    return %c0_i32, %c0_i32_0 : i32, i32
  }
  func.func @transform_5(%arg0: i32) -> (i32, i32) {
    %c0_i32 = arith.constant 0 : i32
    %c0_i32_0 = arith.constant 0 : i32
    %c0_i32_1 = arith.constant 0 : i32
    return %c0_i32, %c0_i32_0 : i32, i32
  }
  func.func @transform_6(%arg0: i32) -> (i32, i32) {
    %c0_i32 = arith.constant 0 : i32
    %c0_i32_0 = arith.constant 0 : i32
    %c0_i32_1 = arith.constant 0 : i32
    return %c0_i32, %c0_i32_0 : i32, i32
  }
  func.func @transform_7(%arg0: i32) -> (i32, i32) {
    %c0_i32 = arith.constant 0 : i32
    %c0_i32_0 = arith.constant 0 : i32
    return %c0_i32, %arg0 : i32, i32
  }
}

</mosaic_0001>

<bundles_post_ra>
// kernel: tpu_custom_call.1
= control target key start
LH: loop header
LB: loop body
LE: loop exit
PB: predicated region body
PF: predicated region fallthrough
CT: control target
= control target key end

     0   :  { %vm99_vm0 = vcmask 261120   ;;  %v731_v6 = vmov 0   ;;  %s950_s0 = inlined_call_operand.vmem [shape: f32[128,32], index: 0, kind: input, shape index: {}]   ;;  %s951_s1 = inlined_call_operand.vmem [shape: f32[64,32], index: 1, kind: input, shape index: {}]   ;;  %s952_s2 = inlined_call_operand.vmem [shape: f32[64,1], index: 2, kind: input, shape index: {}]   ;;  %s953_s3 = inlined_call_operand.vmem [shape: f32[16,64], index: 3, kind: input, shape index: {}]   ;;  %s954_s4 = inlined_call_operand.vmem [shape: f32[16,1], index: 4, kind: input, shape index: {}]   ;;  %s955_s5 = inlined_call_operand.vmem [shape: f32[8,16], index: 5, kind: input, shape index: {}]   ;;  %s956_s6 = inlined_call_operand.vmem [shape: f32[8,1], index: 6, kind: input, shape index: {}]   ;;  %s957_s7 = inlined_call_operand.hbm [shape: f32[8,128], index: 7, kind: output, shape index: {}]  }
   0x1   :  { %v27_v0 = vld [vmem:[%s950_s0] sm:$0xff]  ;;  %v28_v1 = vld [vmem:[%s950_s0 + $0x8] sm:$0xff]  ;;  %v29_v2 = vld [vmem:[%s950_s0 + $0x10] sm:$0xff]  ;;  %705 = vset.pattern.permute.xlu0 %v731_v6  ;;  %706 = vset.pattern.permute.xlu1 %v731_v6 }
   0x2   :  { %v633_v3 = vpack.c.bf16 %v28_v1, %v27_v0  ;;  %vm787_vm1 = vmpackc.low %vm99_vm0, %vm99_vm0  ;;  %v30_v5 = vld [vmem:[%s950_s0 + $0x18] sm:$0xff]  ;;  %v43_v8 = vld [vmem:[%s951_s1] sm:$0xff] }
   0x3   :  { %v639_v7 = vpack.c.bf16 %v30_v5, %v29_v2  ;;  %v31_v9 = vld [vmem:[%s950_s0 + $0x20] sm:$0xff]  ;;  %v32_v10 = vld [vmem:[%s950_s0 + $0x28] sm:$0xff]  ;;  %595 = vmatprep.mubr.msk.f32.mxu0 %vm99_vm0, %v43_v8  ;;  %v53_v13 = vld [vmem:[%s952_s2 + $0x10] sm:$0xff] }
   0x4   :  { %635 = vmatprep.subr.msk.bf16.mxu0 %vm787_vm1, %v633_v3  ;;  %v51_v11 = vld [vmem:[%s952_s2] sm:$0xff]  ;;  %v645_v12 = vpack.c.bf16 %v32_v10, %v31_v9  ;;  %v52_v14 = vld [vmem:[%s952_s2 + $0x8] sm:$0xff]  ;;  %71 = vperm.xlu1 %706, %v53_v13   ;;  %v54_v15 = vld [vmem:[%s952_s2 + $0x18] sm:$0xff] }
   0x5   :  { %638 = vmatpush3.bf16.xpose.msk.msra.mxu0 %vm787_vm1, %v633_v3  ;;  %61 = vperm.xlu0 %705, %v51_v11  }
   0x6   :  { %641 = vmatprep.subr.msk.bf16.mxu0 %vm787_vm1, %v639_v7 }
   0xd   :  { %644 = vmatpush3.bf16.xpose.msk.msra.mxu0 %vm787_vm1, %v639_v7 }
   0xe   :  { %12 = vsyncpa [#allocation3], 0  ;;  %647 = vmatprep.subr.msk.bf16.mxu0 %vm787_vm1, %v645_v12  ;;  %66 = vperm.xlu0 %705, %v52_v14   ;;  %v33_v16 = vld [vmem:[%s950_s0 + $0x30] sm:$0xff]  ;;  %v34_v17 = vld [vmem:[%s950_s0 + $0x38] sm:$0xff]  ;;  %vm315_vm2 = vcmask 523264   ;;  %vm733_vm11 = vmmov 0  }
   0xf   :  { %v55_v18 = vld [vmem:[%s952_s2 + $0x20] sm:$0xff]  ;;  %76 = vperm.xlu1 %706, %v54_v15   ;;  %v56_v19 = vld [vmem:[%s952_s2 + $0x28] sm:$0xff]  ;;  %v651_v20 = vpack.c.bf16 %v34_v17, %v33_v16  ;;  %v57_v21 = vld [vmem:[%s952_s2 + $0x30] sm:$0xff]  ;;  %vm410_vm14 = vcmask 130048  }
  0x10   :  { %v58_v22 = vld [vmem:[%s952_s2 + $0x38] sm:$0xff]  ;;  %v35_v23 = vld [vmem:[%s950_s0 + $0x40] sm:$0xff]  ;;  %v36_v24 = vld [vmem:[%s950_s0 + $0x48] sm:$0xff] }
  0x11   :  { %v303_v25 = vld [vmem:[%s954_s4] sm:$0xff]  ;;  %v304_v26 = vld [vmem:[%s954_s4 + $0x8] sm:$0xff]  ;;  %v657_v27 = vpack.c.bf16 %v36_v24, %v35_v23  ;;  %v37_v29 = vld [vmem:[%s950_s0 + $0x50] sm:$0xff]  ;;  %s735_s4 = smov [#allocation2]  }
  0x12   :  { %81 = vperm.xlu0 %705, %v55_v18   ;;  %v404_v28 = vld [vmem:[%s956_s6] sm:$0xff]  ;;  %v38_v30 = vld [vmem:[%s950_s0 + $0x58] sm:$0xff]  ;;  %v40_v33 = vld [vmem:[%s950_s0 + $0x68] sm:$0xff]  ;;  %s491_s6 = sshll.u32 %s735_s4, 4  ;;  %s492_s6 = int_to_ptr.vmem [resolvable:$true] %s491_s6 }
  0x13   :  { %86 = vperm.xlu1 %706, %v56_v19   ;;  %v663_v31 = vpack.c.bf16 %v38_v30, %v37_v29  ;;  %v39_v32 = vld [vmem:[%s950_s0 + $0x60] sm:$0xff]  ;;  %v41_v35 = vld [vmem:[%s950_s0 + $0x70] sm:$0xff]  ;;  %v42_v36 = vld [vmem:[%s950_s0 + $0x78] sm:$0xff]  ;;  %s707_s24 = scalar_lea.vmem %s492_s6, 128  ;;  %p712_p1 = scmp.lt.s32.totalorder %s492_s6, %s492_s6 }
  0x14   :  { %v669_v34 = vpack.c.bf16 %v40_v33, %v39_v32  ;;  %v675_v37 = vpack.c.bf16 %v42_v36, %v41_v35  ;;  %v44_v38 = vld [vmem:[%s951_s1 + $0x8] sm:$0xff]  ;;  %v45_v39 = vld [vmem:[%s951_s1 + $0x10] sm:$0xff]  ;;  %v46_v40 = vld [vmem:[%s951_s1 + $0x18] sm:$0xff]  ;;  %p708_p0 = scmp.ne.s32.totalorder %s492_s6, %s707_s24  ;;  %p713_p2 = scmp.lt.s32.totalorder %s707_s24, %s707_s24 }
  0x15   :  { %650 = vmatpush3.bf16.xpose.msk.msra.mxu0 %vm787_vm1, %v645_v12  ;;  %v47_v41 = vld [vmem:[%s951_s1 + $0x20] sm:$0xff]  ;;  %v48_v42 = vld [vmem:[%s951_s1 + $0x28] sm:$0xff]  ;;  %v49_v43 = vld [vmem:[%s951_s1 + $0x30] sm:$0xff] }
  0x16   :  { %653 = vmatprep.subr.msk.bf16.mxu0 %vm787_vm1, %v651_v20  ;;  %91 = vperm.xlu0 %705, %v57_v21   ;;  %v50_v44 = vld [vmem:[%s951_s1 + $0x38] sm:$0xff]  ;;  %v301_v45 = vld [vmem:[%s953_s3] sm:$0xff]  ;;  %p714_p3 = por %p713_p2, %p712_p1 }
  0x17   :  { %96 = vperm.xlu1 %706, %v58_v22   ;;  %623 = vmatprep.mubr.msk.f32.mxu1 %vm315_vm2, %v301_v45 }
  0x18   :  { %p715_p4 = pnand %p714_p3, %p708_p0 }
  0x1a   :  { %307 = vperm.xlu0 %705, %v303_v25  }
  0x1b   :  { %312 = vperm.xlu1 %706, %v304_v26   ;;  %v302_v26 = vld [vmem:[%s953_s3 + $0x8] sm:$0xff] }
  0x1d   :  { %656 = vmatpush3.bf16.xpose.msk.msra.mxu0 %vm787_vm1, %v651_v20 }
  0x1e   :  { %659 = vmatprep.subr.msk.bf16.mxu0 %vm787_vm1, %v657_v27  ;;  %407 = vperm.xlu0 %705, %v404_v28   ;;  %v734_v28 = vmov 0.0  }
  0x25   :  { %662 = vmatpush3.bf16.xpose.msk.msra.mxu0 %vm787_vm1, %v657_v27  ;;  %v732_v27 = vmov 0.0|0.0  }
  0x26   :  { %665 = vmatprep.subr.msk.bf16.mxu0 %vm787_vm1, %v663_v31 }
  0x2d   :  { %668 = vmatpush3.bf16.xpose.msk.msra.mxu0 %vm787_vm1, %v663_v31 }
  0x2e   :  { %671 = vmatprep.subr.msk.bf16.mxu0 %vm787_vm1, %v669_v34 }
  0x35   :  { %674 = vmatpush3.bf16.xpose.msk.msra.mxu0 %vm787_vm1, %v669_v34 }
  0x36   :  { %677 = vmatprep.subr.msk.bf16.mxu0 %vm787_vm1, %v675_v37 }
  0x3d   :  { %680 = vmatpush3.bf16.xpose.msk.msra.mxu0 %vm787_vm1, %v675_v37 }
  0x44   :  { %596 = vmatmul.mubr.msk.f32.vlgmr.msra.gmra.mrb[0].mxu0 %vm99_vm0, %v44_v38 }
  0x45   :  { %598 = vmatprep.mubr.msk.f32.mxu0 %vm99_vm0, %v45_v39 }
  0x48   :  { %599 = vmatmul.mubr.msk.f32.gmra.mrb[2].mxu0 %vm99_vm0, %v46_v40  ;;  %v403_v40 = vld [vmem:[%s955_s5] sm:$0xff] }
  0x49   :  { %601 = vmatprep.mubr.msk.f32.mxu0 %vm99_vm0, %v47_v41 }
  0x4c   :  { %602 = vmatmul.mubr.msk.f32.gmra.mrb[4].mxu0 %vm99_vm0, %v48_v42 }
  0x4d   :  { %604 = vmatprep.mubr.msk.f32.mxu0 %vm99_vm0, %v49_v43 }
  0x50   :  { %605 = vmatmul.mubr.msk.f32.gmra.mrb[6].mxu0 %vm99_vm0, %v50_v44 }
  0x83   :  { %v72_v47 = vpop.permute.xlu1 %71 }
  0x84   :  { %v62_v46 = vpop.permute.xlu0 %61 }
  0x8d   :  { %v67_v48 = vpop.permute.xlu0 %66 }
  0x8e   :  { %v77_v49 = vpop.permute.xlu1 %76 }
  0x91   :  { %v82_v63 = vpop.permute.xlu0 %81 }
  0x92   :  { %v87_v60 = vpop.permute.xlu1 %86 }
  0x95   :  { %v92_v14 = vpop.permute.xlu0 %91 }
  0x96   :  { %v97_v11 = vpop.permute.xlu1 %96 }
  0x99   :  { %v308_v31 = vpop.permute.xlu0 %307 }
  0x9a   :  { %v313_v29 = vpop.permute.xlu1 %312 }
  0x9d   :  { %v408_v41 = vpop.permute.xlu0 %407 }
 0x117   :  { %v597_v50 = vpop.f32.mrb[0].mxu0 }
 0x118   :  { %v244_v51 = vadd.f32 %v597_v50, %v67_v48  ;;  %v238_v52 = vpop.f32.mrb[1].mxu0 }
 0x119   :  { %v239_v53 = vadd.f32 %v238_v52, %v62_v46 }
 0x11a   :  { %v286_v54 = vmul.f32 0.01, %v244_v51  ;;  %vm278_vm3 = vcmp.gt.f32.partialorder %v244_v51, 0.0 }
 0x11b   :  { %v285_v55 = vmul.f32 0.01, %v239_v53  ;;  %v600_v56 = vpop.f32.mrb[2].mxu0  ;;  %vm277_vm4 = vcmp.gt.f32.partialorder %v239_v53, 0.0 }
 0x11c   :  { %v254_v57 = vadd.f32 %v600_v56, %v77_v49  ;;  %v248_v58 = vpop.f32.mrb[3].mxu0  ;;  %v294_v59 = vsel %vm278_vm3, %v244_v51, %v286_v54 }
 0x11d   :  { %v249_v61 = vadd.f32 %v248_v58, %v72_v47  ;;  %v293_v62 = vsel %vm277_vm4, %v239_v53, %v285_v55 }
 0x11e   :  { %vm280_vm5 = vcmp.gt.f32.partialorder %v254_v57, 0.0  ;;  %v288_v0 = vmul.f32 0.01, %v254_v57  ;;  %v681_v1 = vpack.c.bf16 %v294_v59, %v293_v62 }
 0x11f   :  { %vm279_vm6 = vcmp.gt.f32.partialorder %v249_v61, 0.0  ;;  %v287_v2 = vmul.f32 0.01, %v249_v61  ;;  %v603_v3 = vpop.f32.mrb[4].mxu0 }
 0x120   :  { %v264_v4 = vadd.f32 %v603_v3, %v87_v60  ;;  %v258_v5 = vpop.f32.mrb[5].mxu0  ;;  %682 = vmatprep.subr.bf16.mxu1 %v681_v1  ;;  %v296_v6 = vsel %vm280_vm5, %v254_v57, %v288_v0 }
 0x121   :  { %v259_v7 = vadd.f32 %v258_v5, %v82_v63  ;;  %684 = vmatpush3.bf16.msra.mxu1 %v681_v1  ;;  %v295_v8 = vsel %vm279_vm6, %v249_v61, %v287_v2 }
 0x122   :  { %vm282_vm7 = vcmp.gt.f32.partialorder %v264_v4, 0.0  ;;  %v290_v9 = vmul.f32 0.01, %v264_v4  ;;  %v685_v10 = vpack.c.bf16 %v296_v6, %v295_v8 }
 0x123   :  { %vm281_vm8 = vcmp.gt.f32.partialorder %v259_v7, 0.0  ;;  %v289_v12 = vmul.f32 0.01, %v259_v7  ;;  %v606_v13 = vpop.f32.mrb[6].mxu0 }
 0x124   :  { %v274_v15 = vadd.f32 %v606_v13, %v97_v11  ;;  %v268_v16 = vpop.f32.mrb[7].mxu0  ;;  %686 = vmatprep.subr.bf16.mxu1 %v685_v10  ;;  %v298_v17 = vsel %vm282_vm7, %v264_v4, %v290_v9 }
 0x125   :  { %v269_v18 = vadd.f32 %v268_v16, %v92_v14  ;;  %688 = vmatpush3.bf16.msra.mxu1 %v685_v10  ;;  %v297_v19 = vsel %vm281_vm8, %v259_v7, %v289_v12 }
 0x126   :  { %vm284_vm9 = vcmp.gt.f32.partialorder %v274_v15, 0.0  ;;  %v292_v20 = vmul.f32 0.01, %v274_v15  ;;  %v689_v21 = vpack.c.bf16 %v298_v17, %v297_v19 }
 0x127   :  { %vm283_vm10 = vcmp.gt.f32.partialorder %v269_v18, 0.0  ;;  %v291_v22 = vmul.f32 0.01, %v269_v18 }
 0x128   :  { %690 = vmatprep.subr.bf16.mxu1 %v689_v21  ;;  %v300_v23 = vsel %vm284_vm9, %v274_v15, %v292_v20 }
 0x129   :  { %692 = vmatpush3.bf16.msra.mxu1 %v689_v21  ;;  %v299_v24 = vsel %vm283_vm10, %v269_v18, %v291_v22 }
 0x12a   :  { %v693_v25 = vpack.c.bf16 %v300_v23, %v299_v24 }
 0x12c   :  { %694 = vmatprep.subr.bf16.mxu1 %v693_v25 }
 0x12d   :  { %696 = vmatpush3.bf16.msra.mxu1 %v693_v25 }
 0x12e   :  { %697 = vmatprep.subr.bf16.mxu1 %v732_v27 }
 0x130   :  { %624 = vmatmul.mubr.msk.f32.vlgmr.msra.gmra.mrb[0].mxu1 %vm315_vm2, %v302_v26 }
 0x131   :  { %630 = vmatprep.mubr.msk.f32.mxu1 %vm733_vm11, %v734_v28 }
 0x203   :  { %v625_v30 = vpop.f32.mrb[0].mxu1 }
 0x204   :  { %v394_v32 = vadd.f32 %v625_v30, %v313_v29  ;;  %v388_v33 = vpop.f32.mrb[1].mxu1 }
 0x205   :  { %v389_v34 = vadd.f32 %v388_v33, %v308_v31 }
 0x206   :  { %vm398_vm12 = vcmp.gt.f32.partialorder %v394_v32, 0.0  ;;  %v400_v35 = vmul.f32 0.01, %v394_v32 }
 0x207   :  { %vm397_vm13 = vcmp.gt.f32.partialorder %v389_v34, 0.0  ;;  %v399_v36 = vmul.f32 0.01, %v389_v34 }
 0x208   :  { %v402_v37 = vsel %vm398_vm12, %v394_v32, %v400_v35 }
 0x209   :  { %v401_v38 = vsel %vm397_vm13, %v389_v34, %v399_v36 }
 0x20a   :  { %v698_v39 = vpack.c.bf16 %v402_v37, %v401_v38 }
 0x20c   :  { %699 = vmatpush3.bf16.msra.mxu1 %v698_v39 }
 0x20f   :  { %631 = vmatmul.mubr.msk.f32.vlgmr.msra.gmra.mrb[2].mxu1 %vm410_vm14, %v403_v40 }
 0x2e2   :  { %v480_v42 = vpop.f32.mrb[2].mxu1 }
 0x2e3   :  { %v481_v43 = vadd.f32 %v480_v42, %v408_v41  ;;  %v632_v44 = vpop.f32.mrb[3].mxu1 }
 0x2e5   :  { %484 = vst [vmem:[#allocation2] sm:$0xff] %v481_v43 }
 0x2e6   :  { %718 = shalt.err (!%p715_p4)
}
 0x2e7   :  { %s719_s5 = scalar_lea.hbm %s957_s7, 128 }
 0x2e8   :  { %p720_p5 = scmp.ne.s32.totalorder %s957_s7, %s719_s5  ;;  %p723_p6 = scmp.lt.u32.totalorder %s719_s5, %s957_s7 }
 0x2ea   :  { %p725_p7 = pnand %p723_p6, %p720_p5 }
 0x2ec   :  { %728 = shalt.err (!%p725_p7)
}
 0x2ed   :  { %494 = dma.vmem_to_hbm [thread:$0]  %s492_s6, 128, %s957_s7, [#allocation3]  }
 0x2ee   :  { %729 = dma.done.wait [#allocation3], 128  }
 0x2ef   :  { %730 = vsyncadd [#allocation3], 4294967168 }
 0x2f0   :  { %498 = vsyncpa [#allocation3], 1 }

</bundles_post_ra>
